<compile_context>
chip_gen: v5e
topology: v5e:2x2
jax: 0.10.0
libtpu: 0.0.40
codegen_flags: <defaults>
</compile_context>

<pallas_src>
import math

import jax
import jax.numpy as jnp
from jax.experimental import pallas as pl
from jax.experimental.pallas import tpu as pltpu

FRACTION_BITS = 16
INTEGER_BITS = 16
_FIXED_SCALE = float(2 ** FRACTION_BITS)            # 65536.0
_FIXED_INV_SCALE = float(2.0 ** (-FRACTION_BITS))   # 2^-16 (exact f32)
_FIXED_BOUND = float(2 ** (INTEGER_BITS - 1))       # 32768.0


def _round_to_fixed(x):
    # round_to_fixed() from the PyTorch reference (integer >= 2 path),
    # strength-reduced to two multiplies by exact powers of two.
    rounded = jnp.floor(x * _FIXED_SCALE) * _FIXED_INV_SCALE
    return jnp.clip(rounded, -_FIXED_BOUND, _FIXED_BOUND - 1.0)


def _round_up(v, m):
    return ((v + m - 1) // m) * m


def linear_shift_kernel(x_ref, v_ref, bias_ref, o_ref):
    k = pl.program_id(2)

    # Output block index is constant over k -> o_ref is resident across the
    # whole reduction; seed it with the bias once, accumulate into it directly.
    @pl.when(k == 0)
    def _init():
        o_ref[...] = jnp.broadcast_to(bias_ref[...], o_ref.shape)

    # Fixed-point quantization of the activation tile (VPU, hidden under MXU).
    x_fixed = _round_to_fixed(x_ref[...])

    # Split the f32 activations into two bf16 terms; the power-of-two weights
    # are exactly bf16, so two native bf16 MXU passes replace an emulated
    # f32 matmul.  (A third term would give full f32 fidelity if ever needed.)
    x_hi = x_fixed.astype(jnp.bfloat16)
    x_lo = (x_fixed - x_hi.astype(jnp.float32)).astype(jnp.bfloat16)

    v = v_ref[...]
    o_ref[...] += (
        jnp.dot(x_hi, v, preferred_element_type=jnp.float32)
        + jnp.dot(x_lo, v, preferred_element_type=jnp.float32)
    )


class LinearShiftTPU:
    """Forward of the PyTorch LinearShift module (use_kernel=False path).

    All weight-side work (sign/shift -> bf16 power-of-two matrix, transpose,
    fixed-point bias, tile padding) happens once here, not per forward call.
    """

    def __init__(self, shift, sign, bias=None, *, tm=512, tn=512, tk=1024):
        out_f, in_f = shift.shape
        self.in_features = int(in_f)
        self.out_features = int(out_f)
        self.tm_max = tm

        # (8,128)-aligned tiles, capped by the (padded) problem size.
        self.tn = min(tn, _round_up(out_f, 128))       # lane-dense output tile
        self.tk = min(tk, _round_up(in_f, 128))
        self.n_p = _round_up(out_f, self.tn)
        self.k_p = _round_up(in_f, self.tk)

        # --- one-time weight precompute (hoisted out of the forward path) ---
        # round(clip(sign,-1,1)) is already in {-1,0,+1}; sign() is redundant.
        sgn = jnp.round(jnp.clip(sign.astype(jnp.float32), -1.0, 1.0))
        v_t = (jnp.exp2(jnp.round(shift.astype(jnp.float32))) * sgn).T  # [in_f, out_f]
        v_t = v_t.astype(jnp.bfloat16)            # +-2^k: exact in bf16
        if (self.k_p, self.n_p) != (in_f, out_f):
            v_t = jnp.pad(v_t, ((0, self.k_p - in_f), (0, self.n_p - out_f)))
        self.v_p = v_t

        if bias is None:
            b = jnp.zeros((1, self.n_p), jnp.float32)
        else:
            b = _round_to_fixed(bias.astype(jnp.float32)).reshape(1, out_f)
            if self.n_p != out_f:
                b = jnp.pad(b, ((0, 0), (0, self.n_p - out_f)))
        self.b_p = b

    def __call__(self, x):
        M, in_f = x.shape
        assert in_f == self.in_features

        # tm: the full (8-aligned) batch when it fits -> grid_m == 1 and the
        # weights stream exactly once; otherwise tile at tm_max.
        m_align = _round_up(max(M, 1), 8)
        tm = m_align if m_align <= self.tm_max else self.tm_max
        m_p = _round_up(M, tm)

        tn = self.tn
        grid_m = m_p // tm
        grid_n = self.n_p // tn
        # v7x has 2 TensorCores: make sure at least 2 "parallel" grid
        # iterations exist when the N tile can be split on a 128 boundary.
        if grid_m == 1 and grid_n == 1 and tn % 256 == 0:
            tn //= 2
            grid_n = self.n_p // tn

        x = x.astype(jnp.float32)
        if (m_p, self.k_p) != (M, in_f):
            # Zero padding: padded K columns contribute 0, padded bias cols
            # are 0, padded output rows/cols are sliced off below.
            x = jnp.pad(x, ((0, m_p - M), (0, self.k_p - in_f)))

        grid = (grid_m, grid_n, self.k_p // self.tk)

        out = pl.pallas_call(
            linear_shift_kernel,
            out_shape=jax.ShapeDtypeStruct((m_p, self.n_p), jnp.float32),
            grid_spec=pltpu.PrefetchScalarGridSpec(
                num_scalar_prefetch=0,
                grid=grid,
                in_specs=[
                    pl.BlockSpec((tm, self.tk), lambda i, j, k: (i, k)),   # x tile (f32)
                    pl.BlockSpec((self.tk, tn), lambda i, j, k: (k, j)),   # bf16 weights
                    pl.BlockSpec((1, tn), lambda i, j, k: (0, j)),         # bias row
                ],
                out_specs=pl.BlockSpec((tm, tn), lambda i, j, k: (i, j)),
            ),
            compiler_params=pltpu.CompilerParams(
                # M, N independent (megacore / 2-TC sharding); K is reduction.
                dimension_semantics=("parallel", "parallel", "arbitrary"),
            ),
        )(x, self.v_p, self.b_p)

        if (m_p, self.n_p) != (M, self.out_features):
            out = out[:M, : self.out_features]
        return out


def reference_linear_shift(x, shift, sign, bias):
    # Pure-JAX reference of the PyTorch forward (use_kernel=False path).
    x_fixed = _round_to_fixed(x)
    b_fixed = _round_to_fixed(bias)
    sgn = jnp.sign(jnp.round(jnp.clip(sign, -1.0, 1.0)))
    v = jnp.exp2(jnp.round(shift)) * sgn                  # [out_f, in_f]
    out = jnp.dot(x_fixed, v.T, precision=jax.lax.Precision.HIGHEST)
    return out + b_fixed[None, :]


if __name__ == "__main__":
    # Small shapes consistent with a Linear layer: batch=8, in=64, out=32.
    # (Padded to 128-lane tiles inside the wrapper; production shapes simply
    #  use more grid steps.)
    N, IN_F, OUT_F = 8, 64, 32

    key = jax.random.PRNGKey(0)
    k_x, k_shift, k_sign, k_bias = jax.random.split(key, 4)

    x = jax.random.normal(k_x, (N, IN_F), dtype=jnp.float32)

    # Parameter init mirroring LinearShift.reset_parameters():
    #   shift ~ U(-10, -1), sign ~ U(-1, 1), bias ~ U(-1/sqrt(fan_in), +...)
    shift = jax.random.uniform(k_shift, (OUT_F, IN_F), minval=-10.0, maxval=-1.0,
                               dtype=jnp.float32)
    sign = jax.random.uniform(k_sign, (OUT_F, IN_F), minval=-1.0, maxval=1.0,
                              dtype=jnp.float32)
    bound = 1.0 / math.sqrt(IN_F)
    bias = jax.random.uniform(k_bias, (OUT_F,), minval=-bound, maxval=bound,
                              dtype=jnp.float32)

    layer = LinearShiftTPU(shift, sign, bias)   # one-time weight precompute
    out = layer(x)
    out = jax.block_until_ready(out)

    ref = reference_linear_shift(x, shift, sign, bias)
    assert out.shape == (N, OUT_F)
    assert jnp.allclose(out, ref, atol=1e-4, rtol=1e-4), "mismatch vs JAX reference"

    print("KERNEL_OK")
</pallas_src>

<mosaic_0001>
module attributes {stable_mosaic.version = 11 : i64} {
  func.func @linear_shift_kernel(%arg0: i32, %arg1: i32, %arg2: i32, %arg3: memref<8x128xf32, #tpu.memory_space<vmem>>, %arg4: memref<128x128xbf16, #tpu.memory_space<vmem>>, %arg5: memref<1x128xf32, #tpu.memory_space<vmem>>, %arg6: memref<8x128xf32, #tpu.memory_space<vmem>>) attributes {dimension_semantics = [#tpu.dimension_semantics<parallel>, #tpu.dimension_semantics<parallel>, #tpu.dimension_semantics<arbitrary>], iteration_bounds = array<i64: 1, 1, 1>, scalar_prefetch = 0 : i64, scratch_operands = 0 : i64, tpu.core_type = #tpu.core_type<tc>, window_params = [{transform_indices = @transform_0, window_bounds = array<i64: 8, 128>}, {transform_indices = @transform_1, window_bounds = array<i64: 128, 128>}, {transform_indices = @transform_2, window_bounds = array<i64: 1, 128>}, {transform_indices = @transform_3, window_bounds = array<i64: 8, 128>}]} {
    %c0_i32 = arith.constant 0 : i32
    %0 = arith.cmpi eq, %arg2, %c0_i32 : i32
    %1 = arith.extui %0 : i1 to i32
    %c0_i32_0 = arith.constant 0 : i32
    %2 = arith.cmpi ne, %1, %c0_i32_0 : i32
    scf.if %2 {
      %c0_13 = arith.constant 0 : index
      %c0_14 = arith.constant 0 : index
      %24 = vector.load %arg5[%c0_13, %c0_14] : memref<1x128xf32, #tpu.memory_space<vmem>>, vector<1x128xf32>
      %25 = vector.shape_cast %24 : vector<1x128xf32> to vector<1x128xf32>
      %26 = vector.broadcast %25 : vector<1x128xf32> to vector<8x128xf32>
      %c0_15 = arith.constant 0 : index
      %c0_16 = arith.constant 0 : index
      %27 = vector.load %arg6[%c0_15, %c0_16] : memref<8x128xf32, #tpu.memory_space<vmem>>, vector<8x128xf32>
      tpu.vector_store %arg6[%c0_15, %c0_16], %26 {strides = array<i32>} : memref<8x128xf32, #tpu.memory_space<vmem>>, vector<8x128xf32>,
    } else {
    }
    %c0 = arith.constant 0 : index
    %c0_1 = arith.constant 0 : index
    %3 = vector.load %arg3[%c0, %c0_1] : memref<8x128xf32, #tpu.memory_space<vmem>>, vector<8x128xf32>
    %cst = arith.constant 6.553600e+04 : f32
    %4 = vector.broadcast %cst : f32 to vector<8x128xf32>
    %5 = arith.mulf %3, %4 : vector<8x128xf32>
    %6 = math.floor %5 : vector<8x128xf32>
    %cst_2 = arith.constant 1.52587891E-5 : f32
    %7 = vector.broadcast %cst_2 : f32 to vector<8x128xf32>
    %8 = arith.mulf %6, %7 : vector<8x128xf32>
    %cst_3 = arith.constant -3.276800e+04 : f32
    %cst_4 = arith.constant 3.276700e+04 : f32
    %9 = vector.broadcast %cst_3 : f32 to vector<8x128xf32>
    %10 = arith.maximumf %9, %8 : vector<8x128xf32>
    %11 = vector.broadcast %cst_4 : f32 to vector<8x128xf32>
    %12 = arith.minimumf %11, %10 : vector<8x128xf32>
    %13 = arith.truncf %12 : vector<8x128xf32> to vector<8x128xbf16>
    %14 = arith.extf %13 : vector<8x128xbf16> to vector<8x128xf32>
    %15 = arith.subf %12, %14 : vector<8x128xf32>
    %16 = arith.truncf %15 : vector<8x128xf32> to vector<8x128xbf16>
    %c0_5 = arith.constant 0 : index
    %c0_6 = arith.constant 0 : index
    %17 = vector.load %arg4[%c0_5, %c0_6] : memref<128x128xbf16, #tpu.memory_space<vmem>>, vector<128x128xbf16>
    %c0_7 = arith.constant 0 : index
    %c0_8 = arith.constant 0 : index
    %18 = vector.load %arg6[%c0_7, %c0_8] : memref<8x128xf32, #tpu.memory_space<vmem>>, vector<8x128xf32>
    %cst_9 = arith.constant dense<0.000000e+00> : vector<8x128xf32>
    %19 = tpu.matmul %13, %17, %cst_9 {dimension_numbers = #tpu.dot_dimension_numbers<[1], [0], [0], [1], [0, 0, 1, 1], [], []>} : vector<8x128xbf16>, vector<128x128xbf16>, vector<8x128xf32> -> vector<8x128xf32>
    %cst_10 = arith.constant dense<0.000000e+00> : vector<8x128xf32>
    %20 = tpu.matmul %16, %17, %cst_10 {dimension_numbers = #tpu.dot_dimension_numbers<[1], [0], [0], [1], [0, 0, 1, 1], [], []>} : vector<8x128xbf16>, vector<128x128xbf16>, vector<8x128xf32> -> vector<8x128xf32>
    %21 = arith.addf %19, %20 : vector<8x128xf32>
    %22 = arith.addf %18, %21 : vector<8x128xf32>
    %c0_11 = arith.constant 0 : index
    %c0_12 = arith.constant 0 : index
    %23 = vector.load %arg6[%c0_11, %c0_12] : memref<8x128xf32, #tpu.memory_space<vmem>>, vector<8x128xf32>
    tpu.vector_store %arg6[%c0_11, %c0_12], %22 {strides = array<i32>} : memref<8x128xf32, #tpu.memory_space<vmem>>, vector<8x128xf32>,
    return
  }
  func.func @transform_0(%arg0: i32, %arg1: i32, %arg2: i32) -> (i32, i32) {
    %c0_i32 = arith.constant 0 : i32
    return %arg0, %arg2 : i32, i32
  }
  func.func @transform_1(%arg0: i32, %arg1: i32, %arg2: i32) -> (i32, i32) {
    %c0_i32 = arith.constant 0 : i32
    return %arg2, %arg1 : i32, i32
  }
  func.func @transform_2(%arg0: i32, %arg1: i32, %arg2: i32) -> (i32, i32) {
    %c0_i32 = arith.constant 0 : i32
    %c0_i32_0 = arith.constant 0 : i32
    return %c0_i32, %arg1 : i32, i32
  }
  func.func @transform_3(%arg0: i32, %arg1: i32, %arg2: i32) -> (i32, i32) {
    %c0_i32 = arith.constant 0 : i32
    return %arg0, %arg1 : i32, i32
  }
}

</mosaic_0001>

<bundles_post_ra>
// kernel: tpu_custom_call.1
= control target key start
LH: loop header
LB: loop body
LE: loop exit
PB: predicated region body
PF: predicated region fallthrough
CT: control target
= control target key end

     0   :  { %8 = vsyncpa [#allocation3], 0  ;;  %s336_s0 = inlined_call_operand.hbm [shape: f32[8,128], index: 0, kind: input, shape index: {}]   ;;  %s337_s1 = inlined_call_operand.hbm [shape: bf16[128,128], index: 1, kind: input, shape index: {}]   ;;  %s338_s2 = inlined_call_operand.vmem [shape: f32[1,128], index: 2, kind: input, shape index: {}]   ;;  %s339_s3 = inlined_call_operand.hbm [shape: f32[8,128], index: 3, kind: output, shape index: {}]  }
   0x1   :  { %9 = vsyncpa [#allocation6], 0 }
   0x2   :  { %10 = vsyncpa [#allocation4], 0  ;;  %s16_s14 = sshll.u32 %s336_s0, 4  ;;  %s299_s15 = smov [#allocation2]   ;;  %s17_s14 = int_to_ptr.hbm [resolvable:$true] %s16_s14 }
   0x3   :  { %s18_s16 = sshll.u32 %s299_s15, 4  ;;  %s26_s19 = sshll.u32 %s337_s1, 4  ;;  %s19_s16 = int_to_ptr.vmem [resolvable:$true] %s18_s16  ;;  %s27_s19 = int_to_ptr.hbm [resolvable:$true] %s26_s19 }
   0x4   :  { %21 = dma.hbm_to_vmem [thread:$0]  %s17_s14, 128, %s19_s16, [#allocation3]  }
   0x5   :  { %s300_s20 = smov [#allocation5]   ;;  %s301_s22 = smov 64  }
   0x6   :  { %s28_s21 = sshll.u32 %s300_s20, 4  ;;  %s302_s23 = smov 4   ;;  %s29_s21 = int_to_ptr.vmem [resolvable:$true] %s28_s21 }
   0x7   :  { %34 = dma.hbm_to_vmem [thread:$0]  %s27_s19, 1024, %s29_s21, [#allocation6], %s301_s22, %s301_s22, %s302_s23  }
   0x8   :  { %293 = dma.done.wait [#allocation3], 128  }
   0x9   :  { %294 = vsyncadd [#allocation3], 4294967168 }
   0xa   :  { %295 = dma.done.wait [#allocation6], 1024  }
   0xb   :  { %296 = vsyncadd [#allocation6], 4294966272  ;;  %v214_v0 = vld [vmem:[#allocation5 + $0x38] sm:$0xff]  ;;  %v213_v1 = vld [vmem:[#allocation5 + $0x30] sm:$0xff]  ;;  %s303_s24 = smov [#allocation7]   ;;  %s164_s28 = sshll.u32 %s339_s3, 4  ;;  %s165_s28 = int_to_ptr.hbm [resolvable:$true] %s164_s28 }
   0xc   :  { %129 = vmatpush.bf16.msra.mxu0 %v214_v0  ;;  %142 = vmatpush.bf16.msra.mxu1 %v214_v0  ;;  %v54_v2 = vld [vmem:[#allocation2] sm:$0xff]  ;;  %v212_v5 = vld [vmem:[#allocation5 + $0x28] sm:$0xff]  ;;  %v211_v8 = vld [vmem:[#allocation5 + $0x20] sm:$0xff]  ;;  %s162_s25 = sshll.u32 %s303_s24, 4  ;;  %s163_s25 = int_to_ptr.vmem [resolvable:$true] %s162_s25 }
   0xd   :  { %v55_v3 = vmul.f32 65536.0, %v54_v2  ;;  %v210_v10 = vld [vmem:[#allocation5 + $0x18] sm:$0xff]  ;;  %v209_v12 = vld [vmem:[#allocation5 + $0x10] sm:$0xff]  ;;  %v208_v14 = vld [vmem:[#allocation5 + $0x8] sm:$0xff] }
   0xe   :  { %v207_v16 = vld [vmem:[#allocation5] sm:$0xff]  ;;  %v220_v18 = vld [vmem:[%s338_s2] ss:$0 sm:$0xff] }
   0xf   :  { %v56_v4 = vfloor.f32 %v55_v3 }
  0x10   :  { %130 = vmatpush.bf16.msra.mxu0 %v213_v1  ;;  %143 = vmatpush.bf16.msra.mxu1 %v213_v1 }
  0x11   :  { %v57_v6 = vmul.f32 1.5258789e-05, %v56_v4 }
  0x13   :  { %v58_v7 = vmax.f32 %v57_v6, -32768.0 }
  0x14   :  { %131 = vmatpush.bf16.msra.mxu0 %v212_v5  ;;  %144 = vmatpush.bf16.msra.mxu1 %v212_v5 }
  0x15   :  { %v59_v9 = vmin.f32 %v58_v7, 32767.0 }
  0x17   :  { %v60_v11 = vpack.c.bf16 %v59_v9, %v59_v9 }
  0x18   :  { %132 = vmatpush.bf16.msra.mxu0 %v211_v8  ;;  %145 = vmatpush.bf16.msra.mxu1 %v211_v8 }
  0x19   :  { %v61_v13 = vunpack.c.l.bf16 %v60_v11 }
  0x1b   :  { %v62_v15 = vsub.f32 %v59_v9, %v61_v13 }
  0x1c   :  { %133 = vmatpush.bf16.msra.mxu0 %v210_v10  ;;  %146 = vmatpush.bf16.msra.mxu1 %v210_v10 }
  0x1d   :  { %v63_v17 = vpack.c.bf16 %v62_v15, %v62_v15 }
  0x20   :  { %134 = vmatpush.bf16.msra.mxu0 %v209_v12  ;;  %147 = vmatpush.bf16.msra.mxu1 %v209_v12 }
  0x24   :  { %135 = vmatpush.bf16.msra.mxu0 %v208_v14  ;;  %148 = vmatpush.bf16.msra.mxu1 %v208_v14 }
  0x28   :  { %136 = vmatpush.bf16.msra.mxu0 %v207_v16  ;;  %149 = vmatpush.bf16.msra.mxu1 %v207_v16 }
  0x2b   :  { %137 = vmatmul.bf16.vlgmr.msra.gmra.mxu0 %v63_v17  ;;  %150 = vmatmul.bf16.vlgmr.msra.gmra.mxu1 %v60_v11 }
  0xa8   :  { %v138_v19 = vpop.f32.mrf.mxu0  ;;  %v151_v20 = vpop.f32.mrf.mxu1 }
  0xa9   :  { %v152_v21 = vadd.f32 %v151_v20, %v138_v19 }
  0xab   :  { %v155_v22 = vadd.f32 %v220_v18, %v152_v21 }
  0xad   :  { %156 = vst [vmem:[#allocation7] sm:$0xff] %v155_v22 }
  0xae   :  { %167 = dma.vmem_to_hbm [thread:$0]  %s163_s25, 128, %s165_s28, [#allocation4]  }
  0xb0   :  { %v140_v23 = vpop.f32.mrf.mxu0  ;;  %v153_v24 = vpop.f32.mrf.mxu1 }
  0xb1   :  { %297 = dma.done.wait [#allocation4], 128  }
  0xb2   :  { %298 = vsyncadd [#allocation4], 4294967168 }
  0xb3   :  { %172 = vsyncpa [#allocation3], 1 }
  0xb4   :  { %173 = vsyncpa [#allocation6], 1 }
  0xb5   :  { %174 = vsyncpa [#allocation4], 1 }

</bundles_post_ra>
